<compile_context>
chip_gen: v7x
topology: tpu7x:2x2x1
jax: 0.10.0
libtpu: 0.0.40
codegen_flags: <defaults>
</compile_context>

<pallas_src>
import functools

import jax
import jax.numpy as jnp
import numpy as np
from jax.experimental import pallas as pl
from jax.experimental.pallas import tpu as pltpu

BN_EPS = 1e-5


def _conv_bn_relu_kernel(x_ref, w_ref, g_ref, b_ref, o_ref,
                         xp_ref, conv_ref, scale_ref, shift_ref,
                         *, ksize, pad, cin, n_total, h_out, w_out):
    # x_ref    : (nb, H, W*Cin)              lane-dense input block (W, Cin merged)
    # w_ref    : (K*(W+2p)*Cin, W_out*Cout)  banded "row-conv" weight
    # g_ref    : (1, Cout)                   BN gamma
    # b_ref    : (1, Cout)                   BN beta
    # o_ref    : (nb*H_out, W_out*Cout)      lane-dense output block
    # xp_ref   : (nb, H+2p, (W+2p)*Cin)      zero-padded staging buffer (scratch)
    # conv_ref : (NB, nb*H_out, W_out*Cout)  f32 conv activation cache (scratch, carry)
    # scale_ref/shift_ref : (1, W_out*Cout)  per-lane BN scale / shift (scratch, carry)
    phase = pl.program_id(0)
    nblk = pl.program_id(1)

    nb, H, _ = x_ref.shape
    Cin = cin
    W = x_ref.shape[2] // Cin
    Cout = g_ref.shape[1]
    K = ksize
    wpc = xp_ref.shape[2]              # (W + 2*pad) * Cin
    rows = nb * h_out                  # matmul M dim for this block
    lanes = w_out * Cout               # output lane width (lane-dense, >= 128)

    @pl.when(jnp.logical_and(phase == 0, nblk == 0))
    def _():
        # Zero the padded staging buffer ONCE; later steps only overwrite the
        # interior, so the halo rows/columns stay zero for the whole grid.
        xp_ref[...] = jnp.zeros_like(xp_ref)

    @pl.when(phase == 0)
    def _():
        # Stage this batch block into the interior of the zero-padded buffer
        # (padding handled in-kernel; no wrapper-side jnp.pad HBM round-trip).
        xp_ref[:, pad:pad + H, pad * Cin:(pad + W) * Cin] = x_ref[...]
        # Fold ALL K*K taps into ONE MXU matmul: concatenate the K vertically shifted
        # row windows along lanes and contract once (depth K*(W+2p)*Cin) against the
        # banded row-conv weight.  The result is already in the lane-dense
        # (rows, W_out*Cout) output layout -> no im2col or output-reshape relayouts.
        xrows = jnp.concatenate(
            [xp_ref[:, kh:kh + h_out, :] for kh in range(K)], axis=-1)
        xrows = xrows.reshape(rows, K * wpc)
        conv_ref[nblk] = jnp.dot(xrows, w_ref[...],
                                 preferred_element_type=jnp.float32)
        # o_ref is deliberately NOT written in phase 0: its index_map pins phase 0 to
        # output block 0, so no garbage HBM writeback happens here.

    @pl.when(jnp.logical_and(phase == 1, nblk == 0))
    def _():
        # Global training-mode BatchNorm statistics (biased variance) over the whole
        # batch, computed from the VMEM-cached conv activations with the numerically
        # stable two-pass form.  Per-channel reductions over the interleaved
        # (j, Cout) lane layout use small 0/1 matmuls instead of lane<->sublane
        # relayout reshapes.
        cnt = jnp.float32(n_total * h_out * w_out)
        y = conv_ref[...].reshape(-1, lanes)                          # (N*H_out, lanes)

        lane_r = jax.lax.broadcasted_iota(jnp.int32, (lanes, Cout), 0)
        chan_r = jax.lax.broadcasted_iota(jnp.int32, (lanes, Cout), 1)
        reduce_mat = (lane_r % Cout == chan_r).astype(jnp.float32)    # lanes -> channel
        chan_s = jax.lax.broadcasted_iota(jnp.int32, (Cout, lanes), 0)
        lane_s = jax.lax.broadcasted_iota(jnp.int32, (Cout, lanes), 1)
        spread_mat = (lane_s % Cout == chan_s).astype(jnp.float32)    # channel -> lanes

        sum_row = jnp.sum(y, axis=0, keepdims=True)                   # (1, lanes)
        mean_c = jnp.dot(sum_row, reduce_mat,
                         preferred_element_type=jnp.float32) / cnt    # (1, Cout)
        mean_row = jnp.dot(mean_c, spread_mat,
                           preferred_element_type=jnp.float32)        # (1, lanes)
        d = y - mean_row
        var_c = jnp.dot(jnp.sum(d * d, axis=0, keepdims=True), reduce_mat,
                        preferred_element_type=jnp.float32) / cnt     # (1, Cout)
        scale_c = g_ref[...] * jax.lax.rsqrt(var_c + BN_EPS)          # (1, Cout)
        shift_c = b_ref[...] - mean_c * scale_c                       # (1, Cout)
        scale_ref[...] = jnp.dot(scale_c, spread_mat,
                                 preferred_element_type=jnp.float32)  # (1, lanes)
        shift_ref[...] = jnp.dot(shift_c, spread_mat,
                                 preferred_element_type=jnp.float32)  # (1, lanes)

    @pl.when(phase == 1)
    def _():
        # BN (scale*x + shift) + ReLU applied to the cached conv activations; the
        # store is one unmasked lane-dense (rows, W_out*Cout) slab per block.
        z = conv_ref[nblk] * scale_ref[...] + shift_ref[...]
        o_ref[...] = jnp.maximum(z, 0.0).astype(o_ref.dtype)


@functools.partial(jax.jit, static_argnames=("ksize", "pad"))
def conv_bn_relu(x_nchw, w_oihw, gamma, beta, *, ksize, pad):
    """Fused Conv2d(k, s=1, p) -> BatchNorm2d(batch stats) -> ReLU.  NCHW in/out."""
    N, Cin, H, W = x_nchw.shape
    Cout = w_oihw.shape[0]
    K = ksize
    Hp, Wp = H + 2 * pad, W + 2 * pad
    H_out, W_out = Hp - K + 1, Wp - K + 1

    # Whole batch per grid step at these shapes (avoids being per-step-overhead bound);
    # the two-phase grid still generalizes to several batch blocks as long as the f32
    # conv activations fit in VMEM.
    nb = N
    assert N % nb == 0
    NB = N // nb

    # Lane-dense input layout: merge W and Cin into the lane dimension (layout glue
    # only; padding is done in-kernel).
    x2 = jnp.transpose(x_nchw, (0, 2, 3, 1)).reshape(N, H, W * Cin)

    # Banded "row-conv" weight:
    #   W_big[(kh*Wp + p)*Cin + c, j*Cout + co] = w[co, c, kh, p - j] if 0 <= p-j < K
    # One depth-(K*Wp*Cin) matmul against this matrix performs the whole conv and
    # yields the output directly in the lane-dense (rows, W_out*Cout) layout.
    w_t = jnp.transpose(w_oihw, (2, 3, 1, 0))                         # (K, K, Cin, Cout)
    p_i = np.arange(Wp)[:, None, None]
    k_i = np.arange(K)[None, :, None]
    j_i = np.arange(W_out)[None, None, :]
    sel = jnp.asarray(p_i == j_i + k_i, dtype=w_oihw.dtype)           # (Wp, K, W_out)
    w_big = jnp.einsum("pkj,hkco->hpcjo", sel, w_t).reshape(
        K * Wp * Cin, W_out * Cout)

    kernel = functools.partial(_conv_bn_relu_kernel, ksize=K, pad=pad, cin=Cin,
                               n_total=N, h_out=H_out, w_out=W_out)

    out2d = pl.pallas_call(
        kernel,
        out_shape=jax.ShapeDtypeStruct((N * H_out, W_out * Cout), x_nchw.dtype),
        grid_spec=pltpu.PrefetchScalarGridSpec(
            num_scalar_prefetch=0,
            grid=(2, NB),                        # (phase, batch block); phase outermost
            in_specs=[
                # Phase 1 never reads x: pin its index to block 0 (no refetch DMA).
                pl.BlockSpec((nb, H, W * Cin), lambda p, n: (n * (1 - p), 0, 0)),
                pl.BlockSpec((K * Wp * Cin, W_out * Cout), lambda p, n: (0, 0)),
                pl.BlockSpec((1, Cout), lambda p, n: (0, 0)),
                pl.BlockSpec((1, Cout), lambda p, n: (0, 0)),
            ],
            # Phase 0 never writes the output; pinning its block index to 0 means the
            # only HBM output traffic is the real phase-1 store (phase 1 writes every
            # block exactly once).
            out_specs=pl.BlockSpec((nb * H_out, W_out * Cout),
                                   lambda p, n: (n * p, 0)),
            scratch_shapes=[
                pltpu.VMEM((nb, Hp, Wp * Cin), jnp.float32),              # staging
                pltpu.VMEM((NB, nb * H_out, W_out * Cout), jnp.float32),  # conv cache
                pltpu.VMEM((1, W_out * Cout), jnp.float32),               # BN scale
                pltpu.VMEM((1, W_out * Cout), jnp.float32),               # BN shift
            ],
        ),
        # Both axes MUST stay "arbitrary": the conv cache and BN scale/shift scratch
        # are carries across the grid; a 'parallel'/megacore split would silently
        # produce partial statistics.
        compiler_params=pltpu.CompilerParams(
            dimension_semantics=("arbitrary", "arbitrary")),
    )(x2, w_big, gamma.reshape(1, Cout), beta.reshape(1, Cout))

    out = out2d.reshape(N, H_out, W_out, Cout)
    return jnp.transpose(out, (0, 3, 1, 2))                              # back to NCHW


def _reference(x, w, gamma, beta, *, pad):
    """Pure-JAX reference matching the PyTorch forward (training-mode BN)."""
    y = jax.lax.conv_general_dilated(
        x, w, window_strides=(1, 1),
        padding=((pad, pad), (pad, pad)),
        dimension_numbers=("NCHW", "OIHW", "NCHW"))
    m = y.mean(axis=(0, 2, 3), keepdims=True)
    v = ((y - m) ** 2).mean(axis=(0, 2, 3), keepdims=True)
    y = (y - m) * jax.lax.rsqrt(v + BN_EPS) * gamma.reshape(1, -1, 1, 1) \
        + beta.reshape(1, -1, 1, 1)
    return jnp.maximum(y, 0.0)


if __name__ == "__main__":
    # ConvBnRelu(in_planes=4, out_planes=16, ksize=3, stride=1, pad=1,
    #            dilation=1, groups=1, has_bn=True, has_relu=True, has_bias=False)
    N, Cin, Cout, H, W = 2, 4, 16, 16, 16
    K, pad = 3, 1

    key = jax.random.PRNGKey(0)
    kx, kw, kg, kb = jax.random.split(key, 4)

    x = jax.random.normal(kx, (N, Cin, H, W), jnp.float32)
    w = jax.random.normal(kw, (Cout, Cin, K, K), jnp.float32) * 0.2   # conv.weight
    gamma = 1.0 + 0.1 * jax.random.normal(kg, (Cout,), jnp.float32)   # bn.weight
    beta = 0.1 * jax.random.normal(kb, (Cout,), jnp.float32)          # bn.bias

    out = conv_bn_relu(x, w, gamma, beta, ksize=K, pad=pad)
    out = jax.block_until_ready(out)

    ref = _reference(x, w, gamma, beta, pad=pad)
    np.testing.assert_allclose(np.asarray(out), np.asarray(ref),
                               rtol=1e-4, atol=1e-4)
    print("KERNEL_OK")
</pallas_src>

<mosaic_0001>
module attributes {stable_mosaic.version = 11 : i64} {
  func.func @_conv_bn_relu_kernel(%arg0: i32, %arg1: i32, %arg2: memref<2x16x64xf32, #tpu.memory_space<vmem>>, %arg3: memref<216x256xf32, #tpu.memory_space<vmem>>, %arg4: memref<1x16xf32, #tpu.memory_space<vmem>>, %arg5: memref<1x16xf32, #tpu.memory_space<vmem>>, %arg6: memref<32x256xf32, #tpu.memory_space<vmem>>, %arg7: memref<2x18x72xf32, #tpu.memory_space<vmem>>, %arg8: memref<1x32x256xf32, #tpu.memory_space<vmem>>, %arg9: memref<1x256xf32, #tpu.memory_space<vmem>>, %arg10: memref<1x256xf32, #tpu.memory_space<vmem>>) attributes {dimension_semantics = [#tpu.dimension_semantics<arbitrary>, #tpu.dimension_semantics<arbitrary>], iteration_bounds = array<i64: 2, 1>, scalar_prefetch = 0 : i64, scratch_operands = 4 : i64, tpu.core_type = #tpu.core_type<tc>, window_params = [{transform_indices = @transform_0, window_bounds = array<i64: 2, 16, 64>}, {pipeline_mode = #tpu.pipeline_mode<synchronous>, transform_indices = @transform_1, window_bounds = array<i64: 216, 256>}, {pipeline_mode = #tpu.pipeline_mode<synchronous>, transform_indices = @transform_2, window_bounds = array<i64: 1, 16>}, {pipeline_mode = #tpu.pipeline_mode<synchronous>, transform_indices = @transform_3, window_bounds = array<i64: 1, 16>}, {transform_indices = @transform_4, window_bounds = array<i64: 32, 256>}]} {
    %c0_i32 = arith.constant 0 : i32
    %0 = arith.cmpi eq, %arg0, %c0_i32 : i32
    %c0_i32_0 = arith.constant 0 : i32
    %1 = arith.cmpi eq, %arg1, %c0_i32_0 : i32
    %2 = arith.andi %0, %1 : i1
    %3 = arith.extui %2 : i1 to i32
    %c0_i32_1 = arith.constant 0 : i32
    %4 = arith.cmpi ne, %3, %c0_i32_1 : i32
    scf.if %4 {
      %cst = arith.constant 0.000000e+00 : f32
      %16 = vector.broadcast %cst : f32 to vector<2x18x72xf32>
      %c0 = arith.constant 0 : index
      %c0_8 = arith.constant 0 : index
      %c0_9 = arith.constant 0 : index
      %17 = vector.load %arg7[%c0, %c0_8, %c0_9] : memref<2x18x72xf32, #tpu.memory_space<vmem>>, vector<2x18x72xf32>
      tpu.vector_store %arg7[%c0, %c0_8, %c0_9], %16 {strides = array<i32>} : memref<2x18x72xf32, #tpu.memory_space<vmem>>, vector<2x18x72xf32>,
    } else {
    }
    %c0_i32_2 = arith.constant 0 : i32
    %5 = arith.cmpi eq, %arg0, %c0_i32_2 : i32
    %6 = arith.extui %5 : i1 to i32
    %c0_i32_3 = arith.constant 0 : i32
    %7 = arith.cmpi ne, %6, %c0_i32_3 : i32
    scf.if %7 {
      %c0 = arith.constant 0 : index
      %c0_8 = arith.constant 0 : index
      %c0_9 = arith.constant 0 : index
      %16 = vector.load %arg2[%c0, %c0_8, %c0_9] : memref<2x16x64xf32, #tpu.memory_space<vmem>>, vector<2x16x64xf32>
      %c0_10 = arith.constant 0 : index
      %c1 = arith.constant 1 : index
      %c4 = arith.constant 4 : index
      %17 = vector.load %arg7[%c0_10, %c1, %c4] : memref<2x18x72xf32, #tpu.memory_space<vmem>>, vector<2x16x64xf32>
      tpu.vector_store %arg7[%c0_10, %c1, %c4], %16 {strides = array<i32>} : memref<2x18x72xf32, #tpu.memory_space<vmem>>, vector<2x16x64xf32>,
      %c0_11 = arith.constant 0 : index
      %c0_12 = arith.constant 0 : index
      %c0_13 = arith.constant 0 : index
      %18 = vector.load %arg7[%c0_11, %c0_12, %c0_13] : memref<2x18x72xf32, #tpu.memory_space<vmem>>, vector<2x16x72xf32>
      %c0_14 = arith.constant 0 : index
      %c1_15 = arith.constant 1 : index
      %c0_16 = arith.constant 0 : index
      %19 = vector.load %arg7[%c0_14, %c1_15, %c0_16] : memref<2x18x72xf32, #tpu.memory_space<vmem>>, vector<2x16x72xf32>
      %c0_17 = arith.constant 0 : index
      %c2 = arith.constant 2 : index
      %c0_18 = arith.constant 0 : index
      %20 = vector.load %arg7[%c0_17, %c2, %c0_18] : memref<2x18x72xf32, #tpu.memory_space<vmem>>, vector<2x16x72xf32>
      %21 = tpu.concatenate %18, %19, %20 in 2 : vector<2x16x72xf32>, vector<2x16x72xf32>, vector<2x16x72xf32> -> vector<2x16x216xf32>
      %22 = vector.shape_cast %21 : vector<2x16x216xf32> to vector<32x216xf32>
      %c0_19 = arith.constant 0 : index
      %c0_20 = arith.constant 0 : index
      %23 = vector.load %arg3[%c0_19, %c0_20] : memref<216x256xf32, #tpu.memory_space<vmem>>, vector<216x256xf32>
      %cst = arith.constant dense<0.000000e+00> : vector<32x256xf32>
      %24 = tpu.matmul %22, %23, %cst {dimension_numbers = #tpu.dot_dimension_numbers<[1], [0], [0], [1], [0, 0, 1, 1], [], []>} : vector<32x216xf32>, vector<216x256xf32>, vector<32x256xf32> -> vector<32x256xf32>
      %25 = arith.index_cast %arg1 : i32 to index
      %c0_21 = arith.constant 0 : index
      %c0_22 = arith.constant 0 : index
      %26 = vector.load %arg8[%25, %c0_21, %c0_22] : memref<1x32x256xf32, #tpu.memory_space<vmem>>, vector<1x32x256xf32>
      %27 = vector.shape_cast %26 : vector<1x32x256xf32> to vector<32x256xf32>
      %28 = vector.shape_cast %24 : vector<32x256xf32> to vector<1x32x256xf32>
      tpu.vector_store %arg8[%25, %c0_21, %c0_22], %28 {strides = array<i32>} : memref<1x32x256xf32, #tpu.memory_space<vmem>>, vector<1x32x256xf32>,
    } else {
    }
    %c1_i32 = arith.constant 1 : i32
    %8 = arith.cmpi eq, %arg0, %c1_i32 : i32
    %c0_i32_4 = arith.constant 0 : i32
    %9 = arith.cmpi eq, %arg1, %c0_i32_4 : i32
    %10 = arith.andi %8, %9 : i1
    %11 = arith.extui %10 : i1 to i32
    %c0_i32_5 = arith.constant 0 : i32
    %12 = arith.cmpi ne, %11, %c0_i32_5 : i32
    scf.if %12 {
      %c0 = arith.constant 0 : index
      %c0_8 = arith.constant 0 : index
      %c0_9 = arith.constant 0 : index
      %16 = vector.load %arg8[%c0, %c0_8, %c0_9] : memref<1x32x256xf32, #tpu.memory_space<vmem>>, vector<1x32x256xf32>
      %17 = vector.shape_cast %16 : vector<1x32x256xf32> to vector<32x256xf32>
      %18 = tpu.iota {dimensions = array<i32: 0>} : vector<256x16xi32>
      %19 = tpu.iota {dimensions = array<i32: 1>} : vector<256x16xi32>
      %c16_i32 = arith.constant 16 : i32
      %c0_i32_10 = arith.constant 0 : i32
      %20 = arith.cmpi eq, %c16_i32, %c0_i32_10 : i32
      %c1_i32_11 = arith.constant 1 : i32
      %21 = arith.select %20, %c1_i32_11, %c16_i32 : i32
      %22 = vector.broadcast %21 : i32 to vector<256x16xi32>
      %23 = arith.remsi %18, %22 : vector<256x16xi32>
      %c0_i32_12 = arith.constant 0 : i32
      %24 = vector.broadcast %c0_i32_12 : i32 to vector<256x16xi32>
      %25 = arith.cmpi ne, %23, %24 : vector<256x16xi32>
      %c0_i32_13 = arith.constant 0 : i32
      %26 = vector.broadcast %c0_i32_13 : i32 to vector<256x16xi32>
      %27 = arith.cmpi slt, %23, %26 : vector<256x16xi32>
      %c0_i32_14 = arith.constant 0 : i32
      %28 = arith.cmpi slt, %21, %c0_i32_14 : i32
      %29 = vector.broadcast %28 : i1 to vector<256x16xi1>
      %30 = vector.broadcast %29 : vector<256x16xi1> to vector<256x16xi1>
      %31 = arith.xori %27, %30 : vector<256x16xi1>
      %32 = arith.andi %31, %25 : vector<256x16xi1>
      %33 = vector.broadcast %21 : i32 to vector<256x16xi32>
      %34 = arith.addi %23, %33 : vector<256x16xi32>
      %35 = arith.select %32, %34, %23 : vector<256x16xi1>, vector<256x16xi32>
      %36 = arith.cmpi eq, %35, %19 : vector<256x16xi32>
      %37 = arith.extui %36 : vector<256x16xi1> to vector<256x16xi32>
      %38 = arith.sitofp %37 : vector<256x16xi32> to vector<256x16xf32>
      %39 = tpu.iota {dimensions = array<i32: 0>} : vector<16x256xi32>
      %40 = tpu.iota {dimensions = array<i32: 1>} : vector<16x256xi32>
      %c16_i32_15 = arith.constant 16 : i32
      %c0_i32_16 = arith.constant 0 : i32
      %41 = arith.cmpi eq, %c16_i32_15, %c0_i32_16 : i32
      %c1_i32_17 = arith.constant 1 : i32
      %42 = arith.select %41, %c1_i32_17, %c16_i32_15 : i32
      %43 = vector.broadcast %42 : i32 to vector<16x256xi32>
      %44 = arith.remsi %40, %43 : vector<16x256xi32>
      %c0_i32_18 = arith.constant 0 : i32
      %45 = vector.broadcast %c0_i32_18 : i32 to vector<16x256xi32>
      %46 = arith.cmpi ne, %44, %45 : vector<16x256xi32>
      %c0_i32_19 = arith.constant 0 : i32
      %47 = vector.broadcast %c0_i32_19 : i32 to vector<16x256xi32>
      %48 = arith.cmpi slt, %44, %47 : vector<16x256xi32>
      %c0_i32_20 = arith.constant 0 : i32
      %49 = arith.cmpi slt, %42, %c0_i32_20 : i32
      %50 = vector.broadcast %49 : i1 to vector<16x256xi1>
      %51 = vector.broadcast %50 : vector<16x256xi1> to vector<16x256xi1>
      %52 = arith.xori %48, %51 : vector<16x256xi1>
      %53 = arith.andi %52, %46 : vector<16x256xi1>
      %54 = vector.broadcast %42 : i32 to vector<16x256xi32>
      %55 = arith.addi %44, %54 : vector<16x256xi32>
      %56 = arith.select %53, %55, %44 : vector<16x256xi1>, vector<16x256xi32>
      %57 = arith.cmpi eq, %56, %39 : vector<16x256xi32>
      %58 = arith.extui %57 : vector<16x256xi1> to vector<16x256xi32>
      %59 = arith.sitofp %58 : vector<16x256xi32> to vector<16x256xf32>
      %cst = arith.constant dense<0.000000e+00> : vector<256xf32>
      %60 = vector.multi_reduction <add>, %17, %cst [0] : vector<32x256xf32> to vector<256xf32>
      %61 = vector.shape_cast %60 : vector<256xf32> to vector<1x256xf32>
      %cst_21 = arith.constant dense<0.000000e+00> : vector<1x16xf32>
      %62 = tpu.matmul %61, %38, %cst_21 {dimension_numbers = #tpu.dot_dimension_numbers<[1], [0], [0], [1], [0, 0, 1, 1], [], []>} : vector<1x256xf32>, vector<256x16xf32>, vector<1x16xf32> -> vector<1x16xf32>
      %cst_22 = arith.constant 5.120000e+02 : f32
      %63 = vector.broadcast %cst_22 : f32 to vector<1x16xf32>
      %64 = arith.divf %62, %63 : vector<1x16xf32>
      %cst_23 = arith.constant dense<0.000000e+00> : vector<1x256xf32>
      %65 = tpu.matmul %64, %59, %cst_23 {dimension_numbers = #tpu.dot_dimension_numbers<[1], [0], [0], [1], [0, 0, 1, 1], [], []>} : vector<1x16xf32>, vector<16x256xf32>, vector<1x256xf32> -> vector<1x256xf32>
      %66 = vector.broadcast %65 : vector<1x256xf32> to vector<32x256xf32>
      %67 = arith.subf %17, %66 : vector<32x256xf32>
      %68 = arith.mulf %67, %67 : vector<32x256xf32>
      %cst_24 = arith.constant dense<0.000000e+00> : vector<256xf32>
      %69 = vector.multi_reduction <add>, %68, %cst_24 [0] : vector<32x256xf32> to vector<256xf32>
      %70 = vector.shape_cast %69 : vector<256xf32> to vector<1x256xf32>
      %cst_25 = arith.constant dense<0.000000e+00> : vector<1x16xf32>
      %71 = tpu.matmul %70, %38, %cst_25 {dimension_numbers = #tpu.dot_dimension_numbers<[1], [0], [0], [1], [0, 0, 1, 1], [], []>} : vector<1x256xf32>, vector<256x16xf32>, vector<1x16xf32> -> vector<1x16xf32>
      %cst_26 = arith.constant 5.120000e+02 : f32
      %72 = vector.broadcast %cst_26 : f32 to vector<1x16xf32>
      %73 = arith.divf %71, %72 : vector<1x16xf32>
      %c0_27 = arith.constant 0 : index
      %c0_28 = arith.constant 0 : index
      %74 = vector.load %arg4[%c0_27, %c0_28] : memref<1x16xf32, #tpu.memory_space<vmem>>, vector<1x16xf32>
      %cst_29 = arith.constant 9.99999974E-6 : f32
      %75 = vector.broadcast %cst_29 : f32 to vector<1x16xf32>
      %76 = arith.addf %73, %75 : vector<1x16xf32>
      %77 = math.rsqrt %76 : vector<1x16xf32>
      %78 = arith.mulf %74, %77 : vector<1x16xf32>
      %c0_30 = arith.constant 0 : index
      %c0_31 = arith.constant 0 : index
      %79 = vector.load %arg5[%c0_30, %c0_31] : memref<1x16xf32, #tpu.memory_space<vmem>>, vector<1x16xf32>
      %80 = arith.mulf %64, %78 : vector<1x16xf32>
      %81 = arith.subf %79, %80 : vector<1x16xf32>
      %cst_32 = arith.constant dense<0.000000e+00> : vector<1x256xf32>
      %82 = tpu.matmul %78, %59, %cst_32 {dimension_numbers = #tpu.dot_dimension_numbers<[1], [0], [0], [1], [0, 0, 1, 1], [], []>} : vector<1x16xf32>, vector<16x256xf32>, vector<1x256xf32> -> vector<1x256xf32>
      %c0_33 = arith.constant 0 : index
      %c0_34 = arith.constant 0 : index
      %83 = vector.load %arg9[%c0_33, %c0_34] : memref<1x256xf32, #tpu.memory_space<vmem>>, vector<1x256xf32>
      tpu.vector_store %arg9[%c0_33, %c0_34], %82 {strides = array<i32>} : memref<1x256xf32, #tpu.memory_space<vmem>>, vector<1x256xf32>,
      %cst_35 = arith.constant dense<0.000000e+00> : vector<1x256xf32>
      %84 = tpu.matmul %81, %59, %cst_35 {dimension_numbers = #tpu.dot_dimension_numbers<[1], [0], [0], [1], [0, 0, 1, 1], [], []>} : vector<1x16xf32>, vector<16x256xf32>, vector<1x256xf32> -> vector<1x256xf32>
      %c0_36 = arith.constant 0 : index
      %c0_37 = arith.constant 0 : index
      %85 = vector.load %arg10[%c0_36, %c0_37] : memref<1x256xf32, #tpu.memory_space<vmem>>, vector<1x256xf32>
      tpu.vector_store %arg10[%c0_36, %c0_37], %84 {strides = array<i32>} : memref<1x256xf32, #tpu.memory_space<vmem>>, vector<1x256xf32>,
    } else {
    }
    %c1_i32_6 = arith.constant 1 : i32
    %13 = arith.cmpi eq, %arg0, %c1_i32_6 : i32
    %14 = arith.extui %13 : i1 to i32
    %c0_i32_7 = arith.constant 0 : i32
    %15 = arith.cmpi ne, %14, %c0_i32_7 : i32
    scf.if %15 {
      %16 = arith.index_cast %arg1 : i32 to index
      %c0 = arith.constant 0 : index
      %c0_8 = arith.constant 0 : index
      %17 = vector.load %arg8[%16, %c0, %c0_8] : memref<1x32x256xf32, #tpu.memory_space<vmem>>, vector<1x32x256xf32>
      %18 = vector.shape_cast %17 : vector<1x32x256xf32> to vector<32x256xf32>
      %c0_9 = arith.constant 0 : index
      %c0_10 = arith.constant 0 : index
      %19 = vector.load %arg9[%c0_9, %c0_10] : memref<1x256xf32, #tpu.memory_space<vmem>>, vector<1x256xf32>
      %20 = vector.broadcast %19 : vector<1x256xf32> to vector<32x256xf32>
      %21 = arith.mulf %18, %20 : vector<32x256xf32>
      %c0_11 = arith.constant 0 : index
      %c0_12 = arith.constant 0 : index
      %22 = vector.load %arg10[%c0_11, %c0_12] : memref<1x256xf32, #tpu.memory_space<vmem>>, vector<1x256xf32>
      %23 = vector.broadcast %22 : vector<1x256xf32> to vector<32x256xf32>
      %24 = arith.addf %21, %23 : vector<32x256xf32>
      %cst = arith.constant 0.000000e+00 : f32
      %25 = vector.broadcast %cst : f32 to vector<32x256xf32>
      %26 = arith.maximumf %24, %25 : vector<32x256xf32>
      %c0_13 = arith.constant 0 : index
      %c0_14 = arith.constant 0 : index
      %27 = vector.load %arg6[%c0_13, %c0_14] : memref<32x256xf32, #tpu.memory_space<vmem>>, vector<32x256xf32>
      tpu.vector_store %arg6[%c0_13, %c0_14], %26 {strides = array<i32>} : memref<32x256xf32, #tpu.memory_space<vmem>>, vector<32x256xf32>,
    } else {
    }
    return
  }
  func.func @transform_0(%arg0: i32, %arg1: i32) -> (i32, i32, i32) {
    %c1_i32 = arith.constant 1 : i32
    %0 = arith.subi %c1_i32, %arg0 : i32
    %1 = arith.muli %arg1, %0 : i32
    %c0_i32 = arith.constant 0 : i32
    %c0_i32_0 = arith.constant 0 : i32
    %c0_i32_1 = arith.constant 0 : i32
    return %1, %c0_i32, %c0_i32_0 : i32, i32, i32
  }
  func.func @transform_1(%arg0: i32, %arg1: i32) -> (i32, i32) {
    %c0_i32 = arith.constant 0 : i32
    %c0_i32_0 = arith.constant 0 : i32
    %c0_i32_1 = arith.constant 0 : i32
    return %c0_i32, %c0_i32_0 : i32, i32
  }
  func.func @transform_2(%arg0: i32, %arg1: i32) -> (i32, i32) {
    %c0_i32 = arith.constant 0 : i32
    %c0_i32_0 = arith.constant 0 : i32
    %c0_i32_1 = arith.constant 0 : i32
    return %c0_i32, %c0_i32_0 : i32, i32
  }
  func.func @transform_3(%arg0: i32, %arg1: i32) -> (i32, i32) {
    %c0_i32 = arith.constant 0 : i32
    %c0_i32_0 = arith.constant 0 : i32
    %c0_i32_1 = arith.constant 0 : i32
    return %c0_i32, %c0_i32_0 : i32, i32
  }
  func.func @transform_4(%arg0: i32, %arg1: i32) -> (i32, i32) {
    %0 = arith.muli %arg1, %arg0 : i32
    %c0_i32 = arith.constant 0 : i32
    %c0_i32_0 = arith.constant 0 : i32
    return %0, %c0_i32 : i32, i32
  }
}

</mosaic_0001>

<bundles_post_ra>
// kernel: conv_bn_relu.1
= control target key start
LH: loop header
LB: loop body
LE: loop exit
PB: predicated region body
PF: predicated region fallthrough
CT: control target
= control target key end

     0   :  { %s2134_s15 = smov 0   ;;  %s2136_s16 = smov 0   ;;  %s2914_s0 = inlined_call_operand.vmem [shape: f32[2,16,64], index: 0, kind: input, shape index: {}]   ;;  %s2915_s1 = inlined_call_operand.vmem [shape: f32[216,256], index: 1, kind: input, shape index: {}]   ;;  %s2916_s2 = inlined_call_operand.vmem [shape: f32[1,16], index: 2, kind: input, shape index: {}]   ;;  %s2917_s3 = inlined_call_operand.vmem [shape: f32[1,16], index: 3, kind: input, shape index: {}]   ;;  %s2918_s4 = inlined_call_operand.vmem [shape: f32[32,256], index: 4, kind: output, shape index: {}]  }
   0x1   :  { %s2138_s17 = smov 0  }
   0x2 LB: > { %s26_s18 = sadd.s32 1, %s2096_s16  ;;  %p1689_p0 = scmp.ge.s32.totalorder %s2100_s17, 1  ;;  %s2100_s17 = sphi %s2138_s17, %s14_s17   ;;  %s2096_s16 = sphi %s2136_s16, %s3065_s16   ;;  %s2092_s15 = sphi %s2134_s15, %s3064_s15  }
   0x3   : > { %p28_p1 = scmp.ge.s32.totalorder %s26_s18, 2  ;;  %p186_p2 = scmp.lt.s32.totalorder %s2100_s17, 3 }
   0x5   : > { %s3067_s18 = smov (%p28_p1, %s26_s18), 0  ;;  %p187_p3 = pnand %p1689_p0, %p186_p2 }
   0x6   : > { %p237_p4 = scmp.eq.s32.totalorder (!%p187_p3), %s2092_s15, 0 }
   0x7   : > { %190 = sbr.rel (%p187_p3) target bundleno = 1470 (0x5be), region = 36 }
   0xe   : > { %242 = sbr.rel (!%p237_p4) target bundleno = 21 (0x15), region = 40  ;;  %vm243_vm0 = vcmask (%p237_p4), 588800   ;;  %vm246_vm1 = vcmask (%p237_p4), 582656   ;;  %v2102_v0 = vmov (%p237_p4), 0.0  }
   0xf   : > { %244 = vst.msk [vmem:[#allocation2] sm:$0xff] (%p237_p4), %vm243_vm0, %v2102_v0  ;;  %245 = vst.msk [vmem:[#allocation2 + $0x8] sm:$0xff] (%p237_p4), %vm243_vm0, %v2102_v0 }
  0x10   : > { %248 = vst.msk [vmem:[#allocation2 + $0x18] sm:$0xff] (%p237_p4), %vm243_vm0, %v2102_v0  ;;  %249 = vst.msk [vmem:[#allocation2 + $0x20] sm:$0xff] (%p237_p4), %vm243_vm0, %v2102_v0 }
  0x11   : > { %247 = vst.msk [vmem:[#allocation2 + $0x10] sm:$0x3] (%p237_p4), %vm246_vm1, %v2102_v0  ;;  %250 = vst.msk [vmem:[#allocation2 + $0x28] sm:$0x3] (%p237_p4), %vm246_vm1, %v2102_v0 }
  0x15 PF: > { %p1691_p5 = scmp.ne.s32.totalorder %s2092_s15, 0 }
  0x16   : > { %v256_v1 = vld [vmem:[%s2914_s0 + $0x10] sm:$0xff] (!%p1691_p5)  ;;  %v254_v2 = vld [vmem:[%s2914_s0] sm:$0xff] (!%p1691_p5)  ;;  %s2103_s23 = smov (!%p1691_p5), 4   ;;  %v257_v3 = vld [vmem:[%s2914_s0 + $0x18] sm:$0xff] (!%p1691_p5)  ;;  %vm274_vm2 = vcmask (!%p1691_p5), 556064   ;;  %s2104_s26 = smov (!%p1691_p5), 72  }
  0x17   : > { %253 = sbr.rel (%p1691_p5) target bundleno = 489 (0x1e9), region = 44  ;;  %266 = vrot.lane.b32.xlu1 (!%p1691_p5), %v256_v1, %s2103_s23  ;;  %262 = vrot.lane.b32.xlu0 (!%p1691_p5), %v254_v2, %s2103_s23  ;;  %v255_v4 = vld [vmem:[%s2914_s0 + $0x8] sm:$0xff] (!%p1691_p5)  ;;  %v336_v6 = vld [vmem:[%s2915_s1 + $0x18] sm:$0xff] (!%p1691_p5)  ;;  %s2105_s27 = smov (!%p1691_p5), 16   ;;  %vm328_vm3 = vcmask (!%p1691_p5), 130048   ;;  %vm387_vm4 = vcmask (!%p1691_p5), 719872  }
  0x18   : > { %v334_v5 = vld [vmem:[%s2915_s1 + $0x8] sm:$0xff] (!%p1691_p5)  ;;  %v333_v7 = vld [vmem:[%s2915_s1] sm:$0xff] (!%p1691_p5)  ;;  %v335_v9 = vld [vmem:[%s2915_s1 + $0x10] sm:$0xff] (!%p1691_p5)  ;;  %vm323_vm5 = vcmask (!%p1691_p5), 588800  }
  0x19   : > { %v1889_v8 = vpack.c.bf16 (!%p1691_p5), %v336_v6, %v334_v5  ;;  %v338_v10 = vld [vmem:[%s2915_s1 + $0x28] sm:$0xff] (!%p1691_p5)  ;;  %v340_v11 = vld [vmem:[%s2915_s1 + $0x38] sm:$0xff] (!%p1691_p5)  ;;  %v1891_v12 = vpack.c.bf16 (!%p1691_p5), %v335_v9, %v333_v7  ;;  %v337_v14 = vld [vmem:[%s2915_s1 + $0x20] sm:$0xff] (!%p1691_p5) }
  0x1a   : > { %v1893_v13 = vpack.c.bf16 (!%p1691_p5), %v340_v11, %v338_v10  ;;  %v339_v15 = vld [vmem:[%s2915_s1 + $0x30] sm:$0xff] (!%p1691_p5)  ;;  %v342_v16 = vld [vmem:[%s2915_s1 + $0x48] sm:$0xff] (!%p1691_p5)  ;;  %v344_v17 = vld [vmem:[%s2915_s1 + $0x58] sm:$0xff] (!%p1691_p5) }
  0x1b   : > { %268 = vrot.lane.b32.xlu1 (!%p1691_p5), %v257_v3, %s2103_s23  ;;  %264 = vrot.lane.b32.xlu0 (!%p1691_p5), %v255_v4, %s2103_s23  ;;  %v1895_v18 = vpack.c.bf16 (!%p1691_p5), %v339_v15, %v337_v14  ;;  %v1897_v19 = vpack.c.bf16 (!%p1691_p5), %v344_v17, %v342_v16  ;;  %v341_v20 = vld [vmem:[%s2915_s1 + $0x40] sm:$0xff] (!%p1691_p5)  ;;  %v343_v21 = vld [vmem:[%s2915_s1 + $0x50] sm:$0xff] (!%p1691_p5) }
  0x1c   : > { %1890 = vmatprep.subr.bf16.mxu0 (!%p1691_p5), %v1889_v8  ;;  %2017 = vmatprep.subr.bf16.mxu1 (!%p1691_p5), %v1889_v8  ;;  %v346_v22 = vld [vmem:[%s2915_s1 + $0x68] sm:$0xff] (!%p1691_p5)  ;;  %v348_v23 = vld [vmem:[%s2915_s1 + $0x78] sm:$0xff] (!%p1691_p5)  ;;  %v1899_v24 = vpack.c.bf16 (!%p1691_p5), %v343_v21, %v341_v20  ;;  %v345_v26 = vld [vmem:[%s2915_s1 + $0x60] sm:$0xff] (!%p1691_p5) }
  0x1d   : > { %1892 = vmatpush1.bf16.msra.mxu0 (!%p1691_p5), %v1891_v12  ;;  %2031 = vmatpush1.bf16.msra.mxu1 (!%p1691_p5), %v1891_v12  ;;  %v1901_v25 = vpack.c.bf16 (!%p1691_p5), %v348_v23, %v346_v22  ;;  %v347_v27 = vld [vmem:[%s2915_s1 + $0x70] sm:$0xff] (!%p1691_p5)  ;;  %v350_v28 = vld [vmem:[%s2915_s1 + $0x88] sm:$0xff] (!%p1691_p5)  ;;  %v352_v29 = vld [vmem:[%s2915_s1 + $0x98] sm:$0xff] (!%p1691_p5) }
  0x1e   : > { %1894 = vmatprep.subr.bf16.mxu0 %v1893_v13  ;;  %2018 = vmatprep.subr.bf16.mxu1 %v1893_v13  ;;  %v1903_v30 = vpack.c.bf16 %v347_v27, %v345_v26  ;;  %v1905_v31 = vpack.c.bf16 %v352_v29, %v350_v28  ;;  %v349_v32 = vld [vmem:[%s2915_s1 + $0x80] sm:$0xff]  ;;  %v351_v33 = vld [vmem:[%s2915_s1 + $0x90] sm:$0xff]  ;;  %v354_v34 = vld [vmem:[%s2915_s1 + $0xa8] sm:$0xff] }
  0x1f   : > { %v356_v35 = vld [vmem:[%s2915_s1 + $0xb8] sm:$0xff]  ;;  %v1907_v36 = vpack.c.bf16 %v351_v33, %v349_v32  ;;  %v353_v38 = vld [vmem:[%s2915_s1 + $0xa0] sm:$0xff]  ;;  %v355_v39 = vld [vmem:[%s2915_s1 + $0xb0] sm:$0xff] }
  0x20   : > { %v1909_v37 = vpack.c.bf16 %v356_v35, %v354_v34  ;;  %v358_v40 = vld [vmem:[%s2915_s1 + $0xc8] sm:$0xff]  ;;  %v360_v41 = vld [vmem:[%s2915_s1 + $0xd8] sm:$0xff]  ;;  %v1911_v42 = vpack.c.bf16 %v355_v39, %v353_v38  ;;  %v357_v44 = vld [vmem:[%s2915_s1 + $0xc0] sm:$0xff] }
  0x21   : > { %1896 = vmatpush1.bf16.msra.mxu0 %v1895_v18  ;;  %2032 = vmatpush1.bf16.msra.mxu1 %v1895_v18  ;;  %v1913_v43 = vpack.c.bf16 %v360_v41, %v358_v40  ;;  %v359_v45 = vld [vmem:[%s2915_s1 + $0xd0] sm:$0xff]  ;;  %v362_v46 = vld [vmem:[%s2915_s1 + $0xe8] sm:$0xff]  ;;  %v364_v47 = vld [vmem:[%s2915_s1 + $0xf8] sm:$0xff] }
  0x22   : > { %1898 = vmatprep.subr.bf16.mxu0 %v1897_v19  ;;  %2019 = vmatprep.subr.bf16.mxu1 %v1897_v19  ;;  %v1915_v48 = vpack.c.bf16 %v359_v45, %v357_v44  ;;  %v1917_v49 = vpack.c.bf16 %v364_v47, %v362_v46  ;;  %v361_v50 = vld [vmem:[%s2915_s1 + $0xe0] sm:$0xff]  ;;  %v363_v51 = vld [vmem:[%s2915_s1 + $0xf0] sm:$0xff]  ;;  %v366_v52 = vld [vmem:[%s2915_s1 + $0x108] sm:$0xff] }
  0x23   : > { %v368_v53 = vld [vmem:[%s2915_s1 + $0x118] sm:$0xff]  ;;  %v1919_v54 = vpack.c.bf16 %v363_v51, %v361_v50  ;;  %v365_v56 = vld [vmem:[%s2915_s1 + $0x100] sm:$0xff]  ;;  %v367_v57 = vld [vmem:[%s2915_s1 + $0x110] sm:$0xff] }
  0x24   : > { %v1921_v55 = vpack.c.bf16 %v368_v53, %v366_v52  ;;  %v370_v58 = vld [vmem:[%s2915_s1 + $0x128] sm:$0xff]  ;;  %v372_v59 = vld [vmem:[%s2915_s1 + $0x138] sm:$0xff]  ;;  %v1923_v60 = vpack.c.bf16 %v367_v57, %v365_v56  ;;  %v369_v62 = vld [vmem:[%s2915_s1 + $0x120] sm:$0xff] }
  0x25   : > { %1900 = vmatpush1.bf16.msra.mxu0 %v1899_v24  ;;  %2033 = vmatpush1.bf16.msra.mxu1 %v1899_v24  ;;  %v1925_v61 = vpack.c.bf16 %v372_v59, %v370_v58  ;;  %v371_v63 = vld [vmem:[%s2915_s1 + $0x130] sm:$0xff]  ;;  %v374_v0 = vld [vmem:[%s2915_s1 + $0x148] sm:$0xff]  ;;  %v376_v1 = vld [vmem:[%s2915_s1 + $0x158] sm:$0xff] }
  0x26   : > { %1902 = vmatprep.subr.bf16.mxu0 %v1901_v25  ;;  %2020 = vmatprep.subr.bf16.mxu1 %v1901_v25  ;;  %v1927_v2 = vpack.c.bf16 %v371_v63, %v369_v62  ;;  %v1929_v3 = vpack.c.bf16 %v376_v1, %v374_v0  ;;  %v373_v4 = vld [vmem:[%s2915_s1 + $0x140] sm:$0xff]  ;;  %v375_v5 = vld [vmem:[%s2915_s1 + $0x150] sm:$0xff]  ;;  %v378_v6 = vld [vmem:[%s2915_s1 + $0x168] sm:$0xff] }
  0x27   : > { %v380_v7 = vld [vmem:[%s2915_s1 + $0x178] sm:$0xff]  ;;  %v1931_v8 = vpack.c.bf16 %v375_v5, %v373_v4  ;;  %v377_v10 = vld [vmem:[%s2915_s1 + $0x160] sm:$0xff]  ;;  %v379_v11 = vld [vmem:[%s2915_s1 + $0x170] sm:$0xff] }
  0x28   : > { %v1933_v9 = vpack.c.bf16 %v380_v7, %v378_v6  ;;  %v1935_v12 = vpack.c.bf16 %v379_v11, %v377_v10  ;;  %v382_v13 = vld [vmem:[%s2915_s1 + $0x188] sm:$0xff]  ;;  %v384_v14 = vld [vmem:[%s2915_s1 + $0x198] sm:$0xff]  ;;  %v381_v16 = vld [vmem:[%s2915_s1 + $0x180] sm:$0xff] }
  0x29   : > { %1904 = vmatpush1.bf16.msra.mxu0 %v1903_v30  ;;  %2034 = vmatpush1.bf16.msra.mxu1 %v1903_v30  ;;  %v1937_v15 = vpack.c.bf16 %v384_v14, %v382_v13  ;;  %v383_v17 = vld [vmem:[%s2915_s1 + $0x190] sm:$0xff]  ;;  %v386_v19 = vld [vmem:[%s2915_s1 + $0x1a8] sm:$0xff]  ;;  %v385_v20 = vld [vmem:[%s2915_s1 + $0x1a0] sm:$0xff] }
  0x2a   : > { %1906 = vmatprep.subr.bf16.mxu0 %v1905_v31  ;;  %2021 = vmatprep.subr.bf16.mxu1 %v1905_v31  ;;  %v1939_v18 = vpack.c.bf16 %v383_v17, %v381_v16 }
  0x2d   : > { %1908 = vmatpush1.bf16.msra.mxu0 %v1907_v36  ;;  %2035 = vmatpush1.bf16.msra.mxu1 %v1907_v36 }
  0x2e   : > { %1910 = vmatprep.subr.bf16.mxu0 %v1909_v37  ;;  %2022 = vmatprep.subr.bf16.mxu1 %v1909_v37 }
  0x31   : > { %1912 = vmatpush1.bf16.msra.mxu0 %v1911_v42  ;;  %2036 = vmatpush1.bf16.msra.mxu1 %v1911_v42 }
  0x32   : > { %1914 = vmatprep.subr.bf16.mxu0 %v1913_v43  ;;  %2023 = vmatprep.subr.bf16.mxu1 %v1913_v43 }
  0x35   : > { %1916 = vmatpush1.bf16.msra.mxu0 %v1915_v48  ;;  %2037 = vmatpush1.bf16.msra.mxu1 %v1915_v48 }
  0x36   : > { %1918 = vmatprep.subr.bf16.mxu0 %v1917_v49  ;;  %2024 = vmatprep.subr.bf16.mxu1 %v1917_v49 }
  0x39   : > { %1920 = vmatpush1.bf16.msra.mxu0 %v1919_v54  ;;  %2038 = vmatpush1.bf16.msra.mxu1 %v1919_v54 }
  0x3a   : > { %1922 = vmatprep.subr.bf16.mxu0 %v1921_v55  ;;  %2025 = vmatprep.subr.bf16.mxu1 %v1921_v55 }
  0x3d   : > { %1924 = vmatpush1.bf16.msra.mxu0 %v1923_v60  ;;  %2039 = vmatpush1.bf16.msra.mxu1 %v1923_v60 }
  0x3e   : > { %1926 = vmatprep.subr.bf16.mxu0 %v1925_v61  ;;  %2026 = vmatprep.subr.bf16.mxu1 %v1925_v61 }
  0x41   : > { %1928 = vmatpush1.bf16.msra.mxu0 %v1927_v2  ;;  %2040 = vmatpush1.bf16.msra.mxu1 %v1927_v2 }
  0x42   : > { %1930 = vmatprep.subr.bf16.mxu0 %v1929_v3  ;;  %2027 = vmatprep.subr.bf16.mxu1 %v1929_v3 }
  0x45   : > { %1932 = vmatpush1.bf16.msra.mxu0 %v1931_v8  ;;  %2041 = vmatpush1.bf16.msra.mxu1 %v1931_v8 }
  0x46   : > { %1934 = vmatprep.subr.bf16.mxu0 %v1933_v9  ;;  %2028 = vmatprep.subr.bf16.mxu1 %v1933_v9 }
  0x49   : > { %1936 = vmatpush1.bf16.msra.mxu0 %v1935_v12  ;;  %2042 = vmatpush1.bf16.msra.mxu1 %v1935_v12 }
  0x4a   : > { %1938 = vmatprep.subr.bf16.mxu0 %v1937_v15  ;;  %2029 = vmatprep.subr.bf16.mxu1 %v1937_v15 }
  0x4d   : > { %1940 = vmatpush1.bf16.msra.mxu0 %v1939_v18  ;;  %2043 = vmatpush1.bf16.msra.mxu1 %v1939_v18 }
  0x4e   : > { %452 = vmatprep.subr.mxu0 %v386_v19  ;;  %2030 = vmatprep.subr.mxu1 %v386_v19 }
  0x51   : > { %453 = vmatpush1.msra.mxu0 %v385_v20  ;;  %2044 = vmatpush1.msra.mxu1 %v385_v20 }
  0x89   : > { %v267_v21 = vpop.permute.xlu1 %266  ;;  %v263_v22 = vpop.permute.xlu0 %262 }
  0x8a   : > { %277 = vst.msk [vmem:[#allocation2 + $0x19] sm:$0xff] %vm274_vm2, %v267_v21  ;;  %275 = vst.msk [vmem:[#allocation2 + $0x1] sm:$0xff] %vm274_vm2, %v263_v22 }
  0x8d   : > { %v269_v23 = vpop.permute.xlu1 %268  ;;  %v265_v24 = vpop.permute.xlu0 %264 }
  0x8e   : > { %278 = vst.msk [vmem:[#allocation2 + $0x21] sm:$0xff] %vm274_vm2, %v269_v23  ;;  %276 = vst.msk [vmem:[#allocation2 + $0x9] sm:$0xff] %vm274_vm2, %v265_v24 }
  0x91   : > { %v285_v25 = vld [vmem:[#allocation2 + $0x19] sm:$0xff]  ;;  %v283_v26 = vld [vmem:[#allocation2 + $0x1] sm:$0xff] }
  0x92   : > { %299 = vrot.lane.b32.xlu1 %v285_v25, %s2104_s26  ;;  %295 = vrot.lane.b32.xlu0 %v283_v26, %s2104_s26  ;;  %v279_v39 = vld [vmem:[#allocation2] sm:$0xff]  ;;  %v281_v40 = vld [vmem:[#allocation2 + $0x18] sm:$0xff] }
  0x95   : > { %v289_v27 = vld [vmem:[#allocation2 + $0x1a] sm:$0xff]  ;;  %v287_v28 = vld [vmem:[#allocation2 + $0x2] sm:$0xff]  ;;  %v288_v32 = vld [vmem:[#allocation2 + $0xa] sm:$0xff] }
  0x96   : > { %315 = vrot.lane.b32.xlu1 %v289_v27, %s2105_s27  ;;  %311 = vrot.lane.b32.xlu0 %v287_v28, %s2105_s27  ;;  %v286_v29 = vld [vmem:[#allocation2 + $0x21] sm:$0xff]  ;;  %v284_v30 = vld [vmem:[#allocation2 + $0x9] sm:$0xff] }
  0x97   : > { %v290_v31 = vld [vmem:[#allocation2 + $0x22] sm:$0xff] }
  0x98   : > { %v280_v49 = vld [vmem:[#allocation2 + $0x8] sm:$0xff]  ;;  %v282_v50 = vld [vmem:[#allocation2 + $0x20] sm:$0xff] }
  0x9a   : > { %301 = vrot.lane.b32.xlu1 %v286_v29, %s2104_s26  ;;  %297 = vrot.lane.b32.xlu0 %v284_v30, %s2104_s26 }
  0x9e   : > { %317 = vrot.lane.b32.xlu1 %v290_v31, %s2105_s27  ;;  %313 = vrot.lane.b32.xlu0 %v288_v32, %s2105_s27 }
 0x104   : > { %v300_v33 = vpop.permute.xlu1 %299  ;;  %v296_v34 = vpop.permute.xlu0 %295 }
 0x105   : > { %v324_v41 = vsel %vm323_vm5, %v279_v39, %v296_v34  ;;  %v326_v42 = vsel %vm323_vm5, %v281_v40, %v300_v33 }
 0x108   : > { %v316_v35 = vpop.permute.xlu1 %315  ;;  %v312_v36 = vpop.permute.xlu0 %311 }
 0x109   : > { %v329_v37 = vsel %vm328_vm3, %v296_v34, %v312_v36  ;;  %v331_v38 = vsel %vm328_vm3, %v300_v33, %v316_v35 }
 0x10a   : > { %1692 = vmatprep.mubr.msk.f32.mxu0 %vm387_vm4, %v329_v37  ;;  %1694 = vmatprep.mubr.msk.f32.mxu1 %vm387_vm4, %v331_v38 }
 0x10b   : > { %465 = vmatmul.mubr.f32.vlgmr.msra.gmra.mrb[0].mxu0 %v324_v41  ;;  %477 = vmatmul.mubr.f32.vlgmr.msra.gmra.mrb[0].mxu1 %v326_v42 }
 0x10c   : > { %v302_v43 = vpop.permute.xlu1 %301  ;;  %v298_v44 = vpop.permute.xlu0 %297 }
 0x10d   : > { %v325_v51 = vsel %vm323_vm5, %v280_v49, %v298_v44  ;;  %v327_v52 = vsel %vm323_vm5, %v282_v50, %v302_v43 }
 0x110   : > { %v318_v45 = vpop.permute.xlu1 %317  ;;  %v314_v46 = vpop.permute.xlu0 %313 }
 0x111   : > { %v332_v47 = vsel %vm328_vm3, %v302_v43, %v318_v45  ;;  %v330_v48 = vsel %vm328_vm3, %v298_v44, %v314_v46 }
 0x112   : > { %1693 = vmatprep.mubr.msk.f32.mxu0 %vm387_vm4, %v330_v48  ;;  %1695 = vmatprep.mubr.msk.f32.mxu1 %vm387_vm4, %v332_v47 }
 0x113   : > { %471 = vmatmul.mubr.f32.gmra.mrb[2].mxu0 %v325_v51  ;;  %483 = vmatmul.mubr.f32.gmra.mrb[2].mxu1 %v327_v52 }
 0x1de   : > { %v466_v53 = vpop.f32.mrb[0].mxu0  ;;  %v478_v54 = vpop.f32.mrb[0].mxu1 }
 0x1df   : > { %492 = vst [vmem:[#allocation3] sm:$0xff] %v466_v53  ;;  %496 = vst [vmem:[#allocation3 + $0x20] sm:$0xff] %v478_v54  ;;  %v468_v55 = vpop.f32.mrb[1].mxu0  ;;  %v480_v56 = vpop.f32.mrb[1].mxu1 }
 0x1e0   : > { %493 = vst [vmem:[#allocation3 + $0x8] sm:$0xff] %v468_v55  ;;  %497 = vst [vmem:[#allocation3 + $0x28] sm:$0xff] %v480_v56 }
 0x1e6   : > { %v472_v57 = vpop.f32.mrb[2].mxu0  ;;  %v484_v58 = vpop.f32.mrb[2].mxu1 }
 0x1e7   : > { %494 = vst [vmem:[#allocation3 + $0x10] sm:$0xff] %v472_v57  ;;  %498 = vst [vmem:[#allocation3 + $0x30] sm:$0xff] %v484_v58  ;;  %v474_v59 = vpop.f32.mrb[3].mxu0  ;;  %v486_v60 = vpop.f32.mrb[3].mxu1 }
 0x1e8   : > { %495 = vst [vmem:[#allocation3 + $0x18] sm:$0xff] %v474_v59  ;;  %499 = vst [vmem:[#allocation3 + $0x38] sm:$0xff] %v486_v60 }
 0x1e9 PF: > { %p500_p6 = scmp.eq.s32.totalorder %s2092_s15, 1 }
 0x1ea   : > { %v513_v61 = vlaneseq (%p500_p6)  ;;  %v2347_v62 = vld [vmem:[#allocation3 + $0x8] sm:$0xff] (%p500_p6)  ;;  %v2960_v23 = vmov (%p500_p6), 0  ;;  %v2964_v25 = vmov (%p500_p6), 0  ;;  %v2966_v26 = vmov (%p500_p6), 0 }
 0x1eb   : > { %504 = sbr.rel (!%p500_p6) target bundleno = 1451 (0x5ab), region = 48  ;;  %v2106_v27 = vmov (%p500_p6), 1.0|1.0   ;;  %v2968_v37 = vmov (%p500_p6), 0  ;;  %v2970_v44 = vmov (%p500_p6), 0  ;;  %v2972_v45 = vmov (%p500_p6), 0 }
 0x1ec   : > { %v2352_v0 = vshrl.u32 (%p500_p6), %v513_v61, 7  ;;  %v2355_v1 = vand.u32 (%p500_p6), 127, %v513_v61  ;;  %v2974_v46 = vmov (%p500_p6), 0  ;;  %v2976_v48 = vmov (%p500_p6), 0  ;;  %v2518_v56 = vld [vmem:[#allocation3 + $0x28] sm:$0xff] (%p500_p6) }
 0x1ed   : > { %v2978_v49 = vmov (%p500_p6), 0  ;;  %v2980_v50 = vmov (%p500_p6), 0  ;;  %v2982_v51 = vmov (%p500_p6), 0 }
 0x1ee   : > { %v530_v3 = vadd.s32 (%p500_p6), 128, %v2352_v0  ;;  %v531_v4 = vadd.s32 (%p500_p6), 136, %v2352_v0  ;;  %v2364_v5 = vadd.s32 (%p500_p6), 8, %v2352_v0  ;;  %v552_v6 = vand.u32 (%p500_p6), 15, %v2352_v0 }
 0x1ef   : > { %v2349_v63 = vld [vmem:[#allocation3 + $0x18] sm:$0xff] (%p500_p6)  ;;  %v532_v7 = vadd.s32 (%p500_p6), 144, %v2352_v0  ;;  %v533_v8 = vadd.s32 (%p500_p6), 152, %v2352_v0  ;;  %v516_v9 = vadd.s32 (%p500_p6), 16, %v2352_v0  ;;  %v517_v10 = vadd.s32 (%p500_p6), 24, %v2352_v0 }
 0x1f0   : > { %v2359_v2 = vadd.f32 (%p500_p6), %v2349_v63, %v2347_v62  ;;  %v664_v11 = vand.u32 (%p500_p6), 15, %v530_v3  ;;  %v671_v12 = vand.u32 (%p500_p6), 15, %v531_v4  ;;  %v559_v13 = vand.u32 (%p500_p6), 15, %v2364_v5 }
 0x1f1   : > { %vm2373_vm6 = vcmp.eq.s32.totalorder (%p500_p6), %v552_v6, %v2355_v1  ;;  %v678_v15 = vand.u32 (%p500_p6), 15, %v532_v7  ;;  %v685_v16 = vand.u32 (%p500_p6), 15, %v533_v8  ;;  %v566_v17 = vand.u32 (%p500_p6), 15, %v516_v9 }
 0x1f2   : > { %v573_v18 = vand.u32 15, %v517_v10  ;;  %vm2378_vm7 = vcmp.eq.s32.totalorder %v664_v11, %v2355_v1  ;;  %vm2383_vm8 = vcmp.eq.s32.totalorder %v671_v12, %v2355_v1  ;;  %vm2388_vm9 = vcmp.eq.s32.totalorder %v559_v13, %v2355_v1 }
 0x1f3   : > { %v534_v22 = vadd.s32 160, %v2352_v0  ;;  %vm2921_vm10 = vmpackc.low %vm2383_vm8, %vm2378_vm7  ;;  %vm2398_vm11 = vcmp.eq.s32.totalorder %v678_v15, %v2355_v1  ;;  %vm2403_vm12 = vcmp.eq.s32.totalorder %v685_v16, %v2355_v1  ;;  %vm2408_vm13 = vcmp.eq.s32.totalorder %v566_v17, %v2355_v1  ;;  %v2557_v15 = vld [vmem:[#allocation3] sm:$0xff]  ;;  %v2559_v16 = vld [vmem:[#allocation3 + $0x10] sm:$0xff] }
 0x1f4   : > { %v2961_v23 = vsel %vm2398_vm11, 4294967295, %v2960_v23  ;;  %v2965_v25 = vsel %vm2408_vm13, 4294967295, %v2964_v25  ;;  %vm2413_vm14 = vcmp.eq.s32.totalorder %v573_v18, %v2355_v1  ;;  %1942 = vmatprep.subr.msk.bf16.mxu0 %vm2921_vm10, %v2106_v27  ;;  %vm2920_vm15 = vmpackc.low %vm2388_vm9, %vm2373_vm6  ;;  %v535_v28 = vadd.s32 168, %v2352_v0 }
 0x1f5   : > { %v2967_v26 = vsel %vm2413_vm14, 4294967295, %v2966_v26  ;;  %v692_v29 = vand.u32 15, %v534_v22  ;;  %v518_v30 = vadd.s32 32, %v2352_v0  ;;  %v519_v31 = vadd.s32 40, %v2352_v0  ;;  %1944 = vmatpush3.bf16.msk.msra.mxu0 %vm2920_vm15, %v2106_v27  ;;  %vm2919_vm0 = vmpackc.low %vm2403_vm12, %vm2398_vm11 }
 0x1f6   : > { %v536_v32 = vadd.s32 176, %v2352_v0  ;;  %v537_v33 = vadd.s32 184, %v2352_v0  ;;  %v520_v34 = vadd.s32 48, %v2352_v0  ;;  %v521_v35 = vadd.s32 56, %v2352_v0  ;;  %1946 = vmatprep.subr.msk.bf16.mxu0 %vm2919_vm0, %v2106_v27  ;;  %vm2923_vm1 = vmpackc.low %vm2413_vm14, %vm2408_vm13 }
 0x1f7   : > { %v699_v36 = vand.u32 15, %v535_v28  ;;  %vm2455_vm2 = vcmp.eq.s32.totalorder %v692_v29, %v2355_v1  ;;  %v580_v38 = vand.u32 15, %v518_v30  ;;  %v587_v39 = vand.u32 15, %v519_v31 }
 0x1f8   : > { %v2969_v37 = vsel %vm2455_vm2, 4294967295, %v2968_v37  ;;  %v706_v40 = vand.u32 15, %v536_v32  ;;  %v713_v41 = vand.u32 15, %v537_v33  ;;  %v594_v42 = vand.u32 15, %v520_v34 }
 0x1f9   : > { %v601_v43 = vand.u32 15, %v521_v35  ;;  %vm2460_vm3 = vcmp.eq.s32.totalorder %v699_v36, %v2355_v1  ;;  %vm2465_vm4 = vcmp.eq.s32.totalorder %v580_v38, %v2355_v1  ;;  %vm2470_vm5 = vcmp.eq.s32.totalorder %v587_v39, %v2355_v1  ;;  %1948 = vmatpush3.bf16.msk.msra.mxu0 %vm2923_vm1, %v2106_v27  ;;  %v2596_v35 = vld [vmem:[#allocation3 + $0x38] sm:$0xff] }
 0x1fa   : > { %v2971_v44 = vsel %vm2460_vm3, 4294967295, %v2970_v44  ;;  %v2973_v45 = vsel %vm2465_vm4, 4294967295, %v2972_v45  ;;  %v2975_v46 = vsel %vm2470_vm5, 4294967295, %v2974_v46  ;;  %v538_v47 = vadd.s32 192, %v2352_v0  ;;  %vm2926_vm0 = vmpackc.low %vm2460_vm3, %vm2455_vm2 }
 0x1fb   : > { %vm2486_vm15 = vcmp.eq.s32.totalorder %v706_v40, %v2355_v1  ;;  %vm2491_vm10 = vcmp.eq.s32.totalorder %v713_v41, %v2355_v1  ;;  %vm2496_vm11 = vcmp.eq.s32.totalorder %v594_v42, %v2355_v1  ;;  %vm2501_vm1 = vcmp.eq.s32.totalorder %v601_v43, %v2355_v1  ;;  %1950 = vmatprep.subr.msk.bf16.mxu0 %vm2926_vm0, %v2106_v27  ;;  %vm2930_vm13 = vmpackc.low %vm2470_vm5, %vm2465_vm4 }
 0x1fc   : > { %v2977_v48 = vsel %vm2486_vm15, 4294967295, %v2976_v48  ;;  %v2979_v49 = vsel %vm2491_vm10, 4294967295, %v2978_v49  ;;  %v2981_v50 = vsel %vm2496_vm11, 4294967295, %v2980_v50  ;;  %v2983_v51 = vsel %vm2501_vm1, 4294967295, %v2982_v51  ;;  %vm2929_vm2 = vmpackc.low %vm2491_vm10, %vm2486_vm15 }
 0x1fd   : > { %v539_v52 = vadd.s32 200, %v2352_v0  ;;  %v720_v53 = vand.u32 15, %v538_v47  ;;  %v522_v54 = vadd.s32 64, %v2352_v0  ;;  %v523_v55 = vadd.s32 72, %v2352_v0  ;;  %1952 = vmatpush3.bf16.msk.msra.mxu0 %vm2930_vm13, %v2106_v27 }
 0x1fe   : > { %v540_v57 = vadd.s32 208, %v2352_v0  ;;  %v541_v58 = vadd.s32 216, %v2352_v0  ;;  %v524_v59 = vadd.s32 80, %v2352_v0  ;;  %v525_v60 = vadd.s32 88, %v2352_v0  ;;  %1954 = vmatprep.subr.msk.bf16.mxu0 %vm2929_vm2, %v2106_v27  ;;  %vm2996_vm2 = vmpackc.low %vm2501_vm1, %vm2496_vm11 }
 0x1ff   : > { %v727_v3 = vand.u32 15, %v539_v52  ;;  %vm2529_vm0 = vcmp.eq.s32.totalorder %v720_v53, %v2355_v1  ;;  %v2984_v4 = vmov 0  ;;  %v608_v6 = vand.u32 15, %v522_v54  ;;  %v2631_v53 = vld [vmem:[#allocation3 + $0x20] sm:$0xff] }
 0x200   : > { %v2985_v4 = vsel %vm2529_vm0, 4294967295, %v2984_v4  ;;  %v615_v7 = vand.u32 15, %v523_v55  ;;  %v734_v8 = vand.u32 15, %v540_v57  ;;  %v741_v9 = vand.u32 15, %v541_v58 }
 0x201   : > { %v1075_v10 = vadd.f32 %v2359_v2, %v2518_v56  ;;  %vm2552_vm4 = vcmp.eq.s32.totalorder %v727_v3, %v2355_v1  ;;  %v2986_v11 = vmov 0  ;;  %v622_v12 = vand.u32 15, %v524_v59  ;;  %1956 = vmatpush3.bf16.msk.msra.mxu0 %vm2996_vm2, %v2106_v27  ;;  %v2645_v59 = vld [vmem:[#allocation3 + $0x30] sm:$0xff] }
 0x202   : > { %v2987_v11 = vsel %vm2552_vm4, 4294967295, %v2986_v11  ;;  %v629_v13 = vand.u32 15, %v525_v60  ;;  %v542_v2 = vadd.s32 224, %v2352_v0  ;;  %vm2566_vm13 = vcmp.eq.s32.totalorder %v608_v6, %v2355_v1  ;;  %vm2997_vm5 = vmpackc.low %vm2552_vm4, %vm2529_vm0 }
 0x203   : > { %v2988_v17 = vmov 0  ;;  %vm2571_vm3 = vcmp.eq.s32.totalorder %v615_v7, %v2355_v1  ;;  %v2990_v18 = vmov 0  ;;  %vm2576_vm15 = vcmp.eq.s32.totalorder %v734_v8, %v2355_v1  ;;  %1958 = vmatprep.subr.msk.bf16.mxu0 %vm2997_vm5, %v2106_v27 }
 0x204   : > { %v2989_v17 = vsel %vm2566_vm13, 4294967295, %v2988_v17  ;;  %v2991_v18 = vsel %vm2571_vm3, 4294967295, %v2990_v18  ;;  %v2992_v22 = vmov 0  ;;  %vm2581_vm10 = vcmp.eq.s32.totalorder %v741_v9, %v2355_v1  ;;  %vm3006_vm5 = vmpackc.low %vm2571_vm3, %vm2566_vm13 }
 0x205   : > { %v2993_v22 = vsel %vm2576_vm15, 4294967295, %v2992_v22  ;;  %v2994_v28 = vmov 0  ;;  %v543_v29 = vadd.s32 232, %v2352_v0  ;;  %v748_v30 = vand.u32 15, %v542_v2  ;;  %1960 = vmatpush3.bf16.msk.msra.mxu0 %vm3006_vm5, %v2106_v27  ;;  %vm3007_vm4 = vmpackc.low %vm2581_vm10, %vm2576_vm15 }
 0x206   : > { %v2995_v28 = vsel %vm2581_vm10, 4294967295, %v2994_v28  ;;  %v526_v31 = vadd.s32 96, %v2352_v0  ;;  %v527_v32 = vadd.s32 104, %v2352_v0  ;;  %v544_v33 = vadd.s32 240, %v2352_v0  ;;  %1962 = vmatprep.subr.msk.bf16.mxu0 %vm3007_vm4, %v2106_v27 }
 0x207   : > { %v545_v34 = vadd.s32 248, %v2352_v0  ;;  %v1065_v36 = vadd.f32 %v2559_v16, %v2557_v15  ;;  %vm2611_vm11 = vcmp.eq.s32.totalorder %v622_v12, %v2355_v1  ;;  %v2998_v38 = vmov 0 }
 0x208   : > { %v2999_v38 = vsel %vm2611_vm11, 4294967295, %v2998_v38  ;;  %vm2616_vm1 = vcmp.eq.s32.totalorder %v629_v13, %v2355_v1  ;;  %v755_v40 = vand.u32 15, %v543_v29  ;;  %v528_v41 = vadd.s32 112, %v2352_v0 }
 0x209   : > { %vm2626_vm2 = vcmp.eq.s32.totalorder %v748_v30, %v2355_v1  ;;  %v3002_v42 = vmov 0  ;;  %v636_v43 = vand.u32 15, %v526_v31  ;;  %v643_v47 = vand.u32 15, %v527_v32  ;;  %vm3016_vm5 = vmpackc.low %vm2616_vm1, %vm2611_vm11 }
 0x20a   : > { %v3003_v42 = vsel %vm2626_vm2, 4294967295, %v3002_v42  ;;  %v529_v52 = vadd.s32 120, %v2352_v0  ;;  %vm2634_vm0 = vcmp.eq.s32.totalorder %v755_v40, %v2355_v1  ;;  %v762_v55 = vand.u32 15, %v544_v33  ;;  %1964 = vmatpush3.bf16.msk.msra.mxu0 %vm3016_vm5, %v2106_v27 }
 0x20b   : > { %v769_v57 = vand.u32 15, %v545_v34  ;;  %v1076_v58 = vadd.f32 %v1075_v10, %v2596_v35  ;;  %v1066_v3 = vadd.f32 %v1065_v36, %v2631_v53  ;;  %vm2663_vm13 = vcmp.eq.s32.totalorder %v636_v43, %v2355_v1  ;;  %vm3017_vm10 = vmpackc.low %vm2634_vm0, %vm2626_vm2 }
 0x20c   : > { %v3008_v6 = vmov 0  ;;  %vm2668_vm4 = vcmp.eq.s32.totalorder %v643_v47, %v2355_v1  ;;  %v650_v8 = vand.u32 15, %v528_v41  ;;  %v657_v9 = vand.u32 15, %v529_v52  ;;  %1966 = vmatprep.subr.msk.bf16.mxu0 %vm3017_vm10, %v2106_v27 }
 0x20d   : > { %v1077_v60 = vrot.slane %v1076_v58, 4  ;;  %v3009_v6 = vsel %vm2663_vm13, 4294967295, %v3008_v6  ;;  %vm2673_vm14 = vcmp.eq.s32.totalorder %v762_v55, %v2355_v1  ;;  %v3012_v10 = vmov 0  ;;  %vm2946_vm3 = vmpackc.low %vm2668_vm4, %vm2663_vm13 }
 0x20e   : > { %v3013_v10 = vsel %vm2673_vm14, 4294967295, %v3012_v10  ;;  %vm2678_vm15 = vcmp.eq.s32.totalorder %v769_v57, %v2355_v1  ;;  %v3014_v12 = vmov 0  ;;  %v1067_v2 = vadd.f32 %v1066_v3, %v2645_v59  ;;  %1968 = vmatpush3.bf16.msk.msra.mxu0 %vm2946_vm3, %v2106_v27 }
 0x20f   : > { %v3015_v12 = vsel %vm2678_vm15, 4294967295, %v3014_v12  ;;  %v1078_v13 = vadd.f32 %v1077_v60, %v1076_v58  ;;  %vm2945_vm11 = vmpackc.low %vm2678_vm15, %vm2673_vm14  ;;  %vm2704_vm5 = vcmp.eq.s32.totalorder %v650_v8, %v2355_v1  ;;  %vm2709_vm2 = vcmp.eq.s32.totalorder %v657_v9, %v2355_v1 }
 0x210   : > { %v1068_v30 = vrot.slane %v1067_v2, 4  ;;  %1970 = vmatprep.subr.msk.bf16.mxu0 %vm2945_vm11, %v2106_v27  ;;  %vm2950_vm10 = vmpackc.low %vm2709_vm2, %vm2704_vm5  ;;  %v1028_v55 = vadd.s32 128, %v2355_v1  ;;  %v1033_v58 = vand.u32 15, %v2355_v1  ;;  %v2107_v1 = vmov 0.0  }
 0x211   : > { %v1079_v29 = vrot.slane %v1078_v13, 2  ;;  %1223 = vmatprep.mubr.f32.mxu1 %v2107_v1  ;;  %v1232_v14 = vsub.s32 0, %v2352_v0 }
 0x212   : > { %v1069_v34 = vadd.f32 %v1068_v30, %v1067_v2  ;;  %1972 = vmatpush3.bf16.msk.msra.mxu0 %vm2950_vm10, %v2106_v27  ;;  %v1040_v57 = vand.u32 15, %v1028_v55  ;;  %vm1053_vm15 = vcmp.eq.s32.totalorder %v1033_v58, %v2352_v0  ;;  %vm1055_vm13 = vcmp.eq.s32.totalorder %v1033_v58, %v2364_v5 }
 0x213   : > { %v1080_v33 = vadd.f32 %v1079_v29, %v1078_v13  ;;  %vm2742_vm10 = vmpackc.low %vm1055_vm13, %vm1053_vm15  ;;  %vm2951_vm13 = vcmask 130048   ;;  %vm3028_vm15 = vnez %v2967_v26 }
 0x214   : > { %v1070_v40 = vrot.slane %v1069_v34, 2  ;;  %vm1054_vm11 = vcmp.eq.s32.totalorder %v1040_v57, %v2352_v0  ;;  %vm1056_vm3 = vcmp.eq.s32.totalorder %v1040_v57, %v2364_v5 }
 0x215   : > { %v1081_v36 = vrot.slane %v1080_v33, 1  ;;  %vm1973_vm14 = vmpackc.low %vm1056_vm3, %vm1054_vm11  ;;  %vm3029_vm3 = vnez %v2965_v25 }
 0x216   : > { %v1071_v43 = vadd.f32 %v1070_v40, %v1069_v34  ;;  %1974 = vmatprep.subr.msk.bf16.mxu1 %vm1973_vm14, %v2106_v27  ;;  %2010 = vmatprep.subr.msk.bf16.mxu0 %vm1973_vm14, %v2106_v27  ;;  %vm3024_vm11 = vmpackc.low %vm2383_vm8, %vm2378_vm7  ;;  %vm3026_vm8 = vnez %v2961_v23  ;;  %v1347_v40 = vld [vmem:[%s2917_s3] sm:$0x1] }
 0x217   : > { %v1082_v41 = vadd.f32 %v1081_v36, %v1080_v33  ;;  %1976 = vmatpush1.bf16.msk.msra.mxu1 %vm2742_vm10, %v2106_v27  ;;  %vm3025_vm7 = vmpackc.low %vm2388_vm9, %vm2373_vm6  ;;  %vm3032_vm6 = vnez %v2969_v37  ;;  %v1343_v33 = vld [vmem:[%s2916_s2] sm:$0x1] }
 0x218   : > { %v1072_v47 = vrot.slane %v1071_v43, 1  ;;  %1978 = vmatprep.subr.msk.bf16.mxu1 %vm3024_vm11, %v2106_v27  ;;  %vm3030_vm11 = vmpackc.low %vm3028_vm15, %vm3029_vm3  ;;  %vm3038_vm15 = vnez %v2977_v48 }
 0x219   : > { %1147 = vmatprep.mubr.f32.mxu0 %v1082_v41 }
 0x21a   : > { %v1073_v52 = vadd.f32 %v1072_v47, %v1071_v43  ;;  %v2108_v47 = vmov 1966171168  }
 0x21c   : > { %1148 = vmatmul.mubr.f32.vlgmr.msra.gmra.mrb[0].mxu0 %v1073_v52  ;;  %v1428_v52 = vunpack.c.l.s4 %v2108_v47 }
 0x21d   : > { %2012 = vmatpush1.bf16.msk.msra.mxu0 %vm2742_vm10, %v2106_v27  ;;  %1417 = vmatprep.mubr.f32.mxu0 %v2107_v1 }
 0x21e   : > { %2014 = vmatprep.subr.msk.bf16.mxu0 %vm1973_vm14, %v2106_v27  ;;  %vm3027_vm14 = vmpackc.low %vm2403_vm12, %vm3026_vm8  ;;  %vm3035_vm12 = vnez %v2973_v45  ;;  %v1429_v55 = vunpack.c.0.s8 %v1428_v52 }
 0x220   : > { %v1432_v58 = vsub.s32 %v1429_v55, %v2352_v0 }
 0x2ef   : > { %v1851_v5 = vpop.f32.mrb[0].mxu0 }
 0x2f0   : > { %v1852_v3 = vpop.f32.mrb[1].mxu0 }
 0x2f1   : > { %v1853_v8 = vadd.f32 %v1852_v3, %v1851_v5 }
 0x2f3   : > { %v2762_v9 = vmul.f32 0.001953125, %v1853_v8 }
 0x2f5   : > { %1769 = vmatmul.mubr.msk.f32.vlgmr.msra.gmra.mrb[0].mxu1 %vm2951_vm13, %v2762_v9  ;;  %vm3031_vm13 = vnez %v2971_v44 }
 0x2f6   : > { %1980 = vmatpush3.bf16.msk.msra.mxu1 %vm3025_vm7, %v2106_v27  ;;  %vm3033_vm9 = vmpackc.low %vm3031_vm13, %vm3032_vm6  ;;  %vm3034_vm7 = vnez %v2975_v46  ;;  %vm3041_vm13 = vnez %v2981_v50 }
 0x2f7   : > { %1982 = vmatprep.subr.msk.bf16.mxu1 %vm3027_vm14, %v2106_v27  ;;  %vm3036_vm8 = vmpackc.low %vm3034_vm7, %vm3035_vm12  ;;  %vm3037_vm14 = vnez %v2979_v49  ;;  %vm3044_vm7 = vnez %v2985_v4 }
 0x2f8   : > { %vm3039_vm3 = vmpackc.low %vm3037_vm14, %vm3038_vm15  ;;  %vm3047_vm14 = vnez %v2989_v17 }
 0x2fa   : > { %1984 = vmatpush3.bf16.msk.msra.mxu1 %vm3030_vm11, %v2106_v27  ;;  %vm3040_vm11 = vnez %v2983_v51 }
 0x2fb   : > { %1986 = vmatprep.subr.msk.bf16.mxu1 %vm3033_vm9, %v2106_v27  ;;  %vm3042_vm6 = vmpackc.low %vm3040_vm11, %vm3041_vm13  ;;  %vm3043_vm9 = vnez %v2987_v11  ;;  %vm3050_vm11 = vnez %v2993_v22 }
 0x2fc   : > { %vm3045_vm12 = vmpackc.low %vm3043_vm9, %vm3044_vm7  ;;  %vm3054_vm7 = vnez %v3003_v42 }
 0x2fe   : > { %1988 = vmatpush3.bf16.msk.msra.mxu1 %vm3036_vm8, %v2106_v27  ;;  %vm3046_vm8 = vnez %v2991_v18 }
 0x2ff   : > { %1990 = vmatprep.subr.msk.bf16.mxu1 %vm3039_vm3, %v2106_v27  ;;  %vm3048_vm15 = vmpackc.low %vm3046_vm8, %vm3047_vm14  ;;  %vm3049_vm3 = vnez %v2995_v28  ;;  %vm3056_vm8 = vnez %v3009_v6 }
 0x300   : > { %vm3051_vm13 = vmpackc.low %vm3049_vm3, %vm3050_vm11 }
 0x301   : > { %vm3057_vm14 = vmpackc.low %vm2668_vm4, %vm3056_vm8 }
 0x302   : > { %1992 = vmatpush3.bf16.msk.msra.mxu1 %vm3042_vm6, %v2106_v27  ;;  %vm3052_vm6 = vnez %v2999_v38 }
 0x303   : > { %1994 = vmatprep.subr.msk.bf16.mxu1 %vm3045_vm12, %v2106_v27  ;;  %vm3053_vm9 = vmpackc.low %vm2616_vm1, %vm3052_vm6  ;;  %vm3059_vm1 = vnez %v3013_v10 }
 0x304   : > { %vm3055_vm12 = vmpackc.low %vm2634_vm0, %vm3054_vm7 }
 0x305   : > { %vm3061_vm0 = vmpackc.low %vm2709_vm2, %vm2704_vm5  ;;  %vm3062_vm2 = vcmask 130048   ;;  %vm1444_vm5 = vcmp.lt.s32.totalorder %v513_v61, 256 }
 0x306   : > { %1996 = vmatpush3.bf16.msk.msra.mxu1 %vm3048_vm15, %v2106_v27  ;;  %vm3058_vm15 = vnez %v3015_v12  ;;  %vm3063_vm4 = vmmov %vm3062_vm2 }
 0x307   : > { %1998 = vmatprep.subr.msk.bf16.mxu1 %vm3051_vm13, %v2106_v27  ;;  %vm3060_vm3 = vmpackc.low %vm3058_vm15, %vm3059_vm1 }
 0x30a   : > { %2000 = vmatpush3.bf16.msk.msra.mxu1 %vm3053_vm9, %v2106_v27 }
 0x30b   : > { %2002 = vmatprep.subr.msk.bf16.mxu1 %vm3055_vm12, %v2106_v27 }
 0x30e   : > { %2004 = vmatpush3.bf16.msk.msra.mxu1 %vm3057_vm14, %v2106_v27 }
 0x30f   : > { %2006 = vmatprep.subr.msk.bf16.mxu1 %vm3060_vm3, %v2106_v27 }
 0x312   : > { %2008 = vmatpush3.bf16.msk.msra.mxu1 %vm3061_vm0, %v2106_v27 }
 0x3c8   : > { %v1225_v19 = vpop.f32.mrb[0].mxu1 }
 0x3c9   : > { %v1233_v20 = vrot.slane %v1225_v19, %v1232_v14  ;;  %v1227_v21 = vpop.f32.mrb[1].mxu1 }
 0x3ca   : > { %v1237_v23 = vrot.slane %v1227_v21, %v1232_v14 }
 0x3cb   : > { %v1238_v24 = vsub.f32 %v2557_v15, %v1233_v20  ;;  %v1240_v25 = vsub.f32 %v2559_v16, %v1233_v20  ;;  %v1242_v26 = vsub.f32 %v2631_v53, %v1233_v20  ;;  %v1244_v46 = vsub.f32 %v2645_v59, %v1233_v20 }
 0x3cc   : > { %v1239_v37 = vsub.f32 %v2347_v62, %v1237_v23  ;;  %v1241_v44 = vsub.f32 %v2349_v63, %v1237_v23  ;;  %v1243_v45 = vsub.f32 %v2518_v56, %v1237_v23  ;;  %v1245_v50 = vsub.f32 %v2596_v35, %v1237_v23 }
 0x3cd   : > { %v1246_v48 = vmul.f32 %v1238_v24, %v1238_v24  ;;  %v1248_v49 = vmul.f32 %v1240_v25, %v1240_v25  ;;  %v1250_v11 = vmul.f32 %v1242_v26, %v1242_v26  ;;  %v1252_v18 = vmul.f32 %v1244_v46, %v1244_v46 }
 0x3ce   : > { %v1247_v51 = vmul.f32 %v1239_v37, %v1239_v37  ;;  %v1249_v4 = vmul.f32 %v1241_v44, %v1241_v44  ;;  %v1251_v17 = vmul.f32 %v1243_v45, %v1243_v45  ;;  %v1253_v28 = vmul.f32 %v1245_v50, %v1245_v50 }
 0x3cf   : > { %v1254_v15 = vadd.f32 %v1248_v49, %v1246_v48 }
 0x3d0   : > { %v1263_v16 = vadd.f32 %v1249_v4, %v1247_v51 }
 0x3d1   : > { %v1255_v22 = vadd.f32 %v1254_v15, %v1250_v11 }
 0x3d2   : > { %v1264_v62 = vadd.f32 %v1263_v16, %v1251_v17 }
 0x3d3   : > { %v1256_v38 = vadd.f32 %v1255_v22, %v1252_v18 }
 0x3d4   : > { %v1265_v63 = vadd.f32 %v1264_v62, %v1253_v28 }
 0x3d5   : > { %v1257_v39 = vrot.slane %v1256_v38, 4 }
 0x3d6   : > { %v1266_v56 = vrot.slane %v1265_v63, 4 }
 0x3d7   : > { %v1258_v42 = vadd.f32 %v1257_v39, %v1256_v38 }
 0x3d8   : > { %v1267_v53 = vadd.f32 %v1266_v56, %v1265_v63 }
 0x3d9   : > { %v1259_v54 = vrot.slane %v1258_v42, 2 }
 0x3da   : > { %v1268_v59 = vrot.slane %v1267_v53, 2 }
 0x3db   : > { %v1260_v6 = vadd.f32 %v1259_v54, %v1258_v42 }
 0x3dc   : > { %v1269_v35 = vadd.f32 %v1268_v59, %v1267_v53 }
 0x3dd   : > { %v1261_v7 = vrot.slane %v1260_v6, 1 }
 0x3de   : > { %v1270_v10 = vrot.slane %v1269_v35, 1 }
 0x3df   : > { %v1262_v13 = vadd.f32 %v1261_v7, %v1260_v6 }
 0x3e0   : > { %v1271_v12 = vadd.f32 %v1270_v10, %v1269_v35 }
 0x3e2   : > { %1336 = vmatprep.mubr.f32.mxu1 %v1271_v12 }
 0x3e3   : > { %1337 = vmatmul.mubr.f32.vlgmr.msra.gmra.mrb[2].mxu1 %v1262_v13 }
 0x4b6   : > { %v1886_v2 = vpop.f32.mrb[2].mxu1 }
 0x4b7   : > { %v1887_v29 = vpop.f32.mrb[3].mxu1 }
 0x4b8   : > { %v1888_v30 = vadd.f32 %v1887_v29, %v1886_v2 }
 0x4ba   : > { %v1342_v31 = vmul.f32 0.001953125, %v1888_v30 }
 0x4bc   : > { %v1344_v32 = vadd.f32 1e-05, %v1342_v31 }
 0x4be   : > { %2076 = vrsqrt.f32 %v1344_v32 }
 0x4c8   : > { %v2077_v34 = vpop.eup %2076 }
 0x4c9   : > { %v1346_v36 = vmul.f32 %v2077_v34, %v1343_v33 }
 0x4cb   : > { %1806 = vmatmul.mubr.msk.f32.vlgmr.msra.gmra.mrb[2].mxu0 %vm3062_vm2, %v1346_v36  ;;  %v1348_v41 = vmul.f32 %v1346_v36, %v2762_v9 }
 0x4cc   : > { %2016 = vmatpush1.bf16.msk.msra.mxu0 %vm2742_vm10, %v2106_v27  ;;  %1514 = vmatprep.mubr.f32.mxu0 %v2107_v1 }
 0x4cd   : > { %v1349_v43 = vsub.f32 %v1347_v40, %v1348_v41 }
 0x4cf   : > { %1811 = vmatmul.mubr.msk.f32.vlgmr.msra.gmra.mrb[4].mxu0 %vm3063_vm4, %v1349_v43 }
 0x59e   : > { %v1419_v57 = vpop.f32.mrb[2].mxu0 }
 0x59f   : > { %v1421_v5 = vpop.f32.mrb[3].mxu0 }
 0x5a0   : > { %v1426_v3 = vcombine.low %v1419_v57, %v1421_v5 }
 0x5a2   : > { %v1433_v8 = vrot.slane %v1426_v3, %v1432_v58  ;;  %v1516_v14 = vpop.f32.mrb[4].mxu0 }
 0x5a3   : > { %v1518_v9 = vpop.f32.mrb[5].mxu0 }
 0x5a4   : > { %v1440_v60 = vrot.slane %v1433_v8, %v1432_v58  ;;  %v1523_v27 = vcombine.low %v1516_v14, %v1518_v9 }
 0x5a6   : > { %1446 = vst.msk [vmem:[#allocation4] sm:$0x3] %vm1444_vm5, %v1440_v60  ;;  %v1530_v1 = vrot.slane %v1523_v27, %v1432_v58 }
 0x5a8   : > { %v1537_v19 = vrot.slane %v1530_v1, %v1432_v58 }
 0x5aa   : > { %1539 = vst.msk [vmem:[#allocation5] sm:$0x3] %vm1444_vm5, %v1537_v19 }
 0x5ab PF: > { %p1812_p7 = scmp.ne.s32.totalorder %s2092_s15, 1 }
 0x5ac   : > { %v1556_v20 = vlaneseq (!%p1812_p7)  ;;  %v1546_v24 = vld [vmem:[#allocation3] sm:$0xff] (!%p1812_p7)  ;;  %v1547_v26 = vld [vmem:[#allocation3 + $0x8] sm:$0xff] (!%p1812_p7)  ;;  %v1548_v61 = vld [vmem:[#allocation3 + $0x10] sm:$0xff] (!%p1812_p7) }
 0x5ad   : > { %1542 = sbr.rel (%p1812_p7) target bundleno = 1470 (0x5be), region = 52  ;;  %v1554_v0 = vld [vmem:[#allocation4] sm:$0x3] (!%p1812_p7)  ;;  %v1549_v44 = vld [vmem:[#allocation3 + $0x18] sm:$0xff] (!%p1812_p7)  ;;  %v1551_v51 = vld [vmem:[#allocation3 + $0x28] sm:$0xff] (!%p1812_p7) }
 0x5ae   : > { %v1557_v21 = vshrl.u32 (!%p1812_p7), %v1556_v20, 7  ;;  %v1550_v45 = vld [vmem:[#allocation3 + $0x20] sm:$0xff] (!%p1812_p7)  ;;  %v1552_v4 = vld [vmem:[#allocation3 + $0x30] sm:$0xff] (!%p1812_p7)  ;;  %v1553_v11 = vld [vmem:[#allocation3 + $0x38] sm:$0xff] (!%p1812_p7) }
 0x5b0   : > { %v1558_v25 = vsub.s32 (!%p1812_p7), 0, %v1557_v21  ;;  %v1562_v37 = vsub.s32 (!%p1812_p7), 1, %v1557_v21 }
 0x5b1   : > { %v1574_v23 = vld [vmem:[#allocation5] sm:$0x3] (!%p1812_p7) }
 0x5b2   : > { %v1559_v46 = vrot.slane (!%p1812_p7), %v1554_v0, %v1558_v25  ;;  %v1579_v48 = vrot.slane (!%p1812_p7), %v1574_v23, %v1558_v25  ;;  %v1563_v49 = vrot.slane (!%p1812_p7), %v1554_v0, %v1562_v37  ;;  %v1583_v50 = vrot.slane (!%p1812_p7), %v1574_v23, %v1562_v37 }
 0x5b4   : > { %v1566_v15 = vmul.f32 %v1559_v46, %v1546_v24  ;;  %v1567_v17 = vmul.f32 %v1563_v49, %v1547_v26  ;;  %v1568_v16 = vmul.f32 %v1559_v46, %v1548_v61  ;;  %v1569_v18 = vmul.f32 %v1563_v49, %v1549_v44 }
 0x5b5   : > { %v1570_v22 = vmul.f32 %v1559_v46, %v1550_v45  ;;  %v1571_v28 = vmul.f32 %v1563_v49, %v1551_v51  ;;  %v1572_v62 = vmul.f32 %v1559_v46, %v1552_v4  ;;  %v1573_v38 = vmul.f32 %v1563_v49, %v1553_v11 }
 0x5b6   : > { %v1586_v63 = vadd.f32 %v1579_v48, %v1566_v15  ;;  %v1587_v39 = vadd.f32 %v1583_v50, %v1567_v17  ;;  %v1588_v56 = vadd.f32 %v1579_v48, %v1568_v16  ;;  %v1589_v42 = vadd.f32 %v1583_v50, %v1569_v18 }
 0x5b7   : > { %v1590_v53 = vadd.f32 %v1579_v48, %v1570_v22  ;;  %v1591_v54 = vadd.f32 %v1583_v50, %v1571_v28  ;;  %v1592_v59 = vadd.f32 %v1579_v48, %v1572_v62  ;;  %v1593_v6 = vadd.f32 %v1583_v50, %v1573_v38 }
 0x5b8   : > { %v1594_v35 = vmax.f32 %v1586_v63, 0.0  ;;  %v1595_v7 = vmax.f32 %v1587_v39, 0.0  ;;  %v1596_v10 = vmax.f32 %v1588_v56, 0.0  ;;  %v1597_v12 = vmax.f32 %v1589_v42, 0.0 }
 0x5b9   : > { %v1598_v13 = vmax.f32 %v1590_v53, 0.0  ;;  %v1599_v2 = vmax.f32 %v1591_v54, 0.0  ;;  %v1600_v29 = vmax.f32 %v1592_v59, 0.0  ;;  %v1601_v30 = vmax.f32 %v1593_v6, 0.0 }
 0x5ba   : > { %1602 = vst [vmem:[%s2918_s4] sm:$0xff] %v1594_v35  ;;  %1603 = vst [vmem:[%s2918_s4 + $0x8] sm:$0xff] %v1595_v7 }
 0x5bb   : > { %1604 = vst [vmem:[%s2918_s4 + $0x10] sm:$0xff] %v1596_v10  ;;  %1605 = vst [vmem:[%s2918_s4 + $0x18] sm:$0xff] %v1597_v12 }
 0x5bc   : > { %1606 = vst [vmem:[%s2918_s4 + $0x20] sm:$0xff] %v1598_v13  ;;  %1607 = vst [vmem:[%s2918_s4 + $0x28] sm:$0xff] %v1599_v2 }
 0x5bd   : > { %1608 = vst [vmem:[%s2918_s4 + $0x30] sm:$0xff] %v1600_v29  ;;  %1609 = vst [vmem:[%s2918_s4 + $0x38] sm:$0xff] %v1601_v30 }
 0x5be PF: > { %s14_s17 = sadd.s32 1, %s2100_s17   ;;  %s3064_s15 = smov %s2096_s16 }
 0x5bf   : > { %p11_p8 = scmp.ge.s32.totalorder %s14_s17, 4   ;;  %s3065_s16 = smov %s3067_s18 }
 0x5c1   :  { %13 = sbr.rel (!%p11_p8) target bundleno = 2 (0x2), region = 84 }

</bundles_post_ra>
